<compile_context>
chip_gen: v7x
topology: tpu7x:2x2x1
jax: 0.10.0
libtpu: 0.0.40
codegen_flags: <defaults>
</compile_context>

<pallas_src>
import jax
import jax.numpy as jnp
from jax.experimental import pallas as pl
from jax.experimental.pallas import tpu as pltpu

SPLIT = 256   # aten.split.Tensor(arg56_1, 256) -> first chunk has 256 rows


def _split_add_kernel(x_ref, a_ref, o_ref):
    # Elementwise add of the current (TR, D) tile, in the promoted dtype.
    o_ref[...] = x_ref[...].astype(o_ref.dtype) + a_ref[...].astype(o_ref.dtype)


def _sublane_pack(itemsize: int) -> int:
    # Rows per packed sublane tile: f32 -> 8, bf16/f16 -> 16, int8/fp8 -> 32.
    return max(8, 32 // max(1, itemsize))


def _vmem_limit_bytes() -> int:
    # ~3/4 of physical VMEM per generation (v5e/v6e 128 MiB -> 96 MiB,
    # v7x 64 MiB -> 48 MiB); conservative 48 MiB fallback if the trace-time
    # hardware query is unavailable.
    try:
        cap = int(pltpu.get_tpu_info().vmem_capacity_bytes)
    except Exception:
        cap = 64 * 1024 * 1024
    return (cap * 3) // 4


def pattern_module_forward(arg56_1: jax.Array, addend: jax.Array,
                           *, donate_addend: bool = False) -> jax.Array:
    """Returns arg56_1[:256] + addend, computed in a Pallas TPU kernel."""
    S_total, D = arg56_1.shape
    assert S_total >= SPLIT, "arg56_1 must have at least 256 rows (split size)"
    assert addend.shape == (SPLIT, D), "addend must match the first split chunk"

    # Match JAX/PyTorch float type promotion (note: torch integer-mixed-width
    # promotion corner cases may differ; fine for the float case here).
    out_dtype = jnp.result_type(arg56_1.dtype, addend.dtype)
    x_sz = jnp.dtype(arg56_1.dtype).itemsize
    a_sz = jnp.dtype(addend.dtype).itemsize
    o_sz = jnp.dtype(out_dtype).itemsize

    vmem_limit = _vmem_limit_bytes()
    # Live-buffer budget: 3 arrays x 2 (default double buffering); leave the
    # remaining quarter of the scoped limit as headroom for compiler scratch.
    budget = (vmem_limit * 3) // 4

    pack = _sublane_pack(max(x_sz, a_sz, o_sz))
    # Start at 128 rows so the row grid always has >= 2 parallel steps (v7x
    # megacore); halve until the six live (TR, D) blocks fit the budget.
    # TR stays a power of two >= pack, so it always divides SPLIT = 256.
    per_row_bytes = 2 * D * (x_sz + a_sz + o_sz)   # double-buffered row cost
    TR = 128
    while TR > pack and TR * per_row_bytes > budget:
        TR //= 2
    # TODO(synk): for astronomically wide D (> ~budget/(pack*per_row_bytes))
    # a secondary lane tiling would be needed; unreachable at realistic sizes.

    grid = (SPLIT // TR,)

    cost = pl.CostEstimate(
        flops=SPLIT * D,
        transcendentals=0,
        bytes_accessed=SPLIT * D * (x_sz + a_sz + o_sz),
    )

    io_aliases = {}
    if donate_addend and jnp.dtype(addend.dtype) == jnp.dtype(out_dtype):
        io_aliases = {1: 0}   # write the result in place over addend

    return pl.pallas_call(
        _split_add_kernel,
        out_shape=jax.ShapeDtypeStruct((SPLIT, D), out_dtype),
        grid=grid,
        in_specs=[
            # Row block i of the FIRST 256 rows of arg56_1 == rows of
            # split(arg56_1, 256)[0]; the tail of arg56_1 is never DMA'd.
            pl.BlockSpec((TR, D), lambda i: (i, 0)),
            pl.BlockSpec((TR, D), lambda i: (i, 0)),
        ],
        out_specs=pl.BlockSpec((TR, D), lambda i: (i, 0)),
        compiler_params=pltpu.CompilerParams(
            # Independent row blocks -> shard across TCs on v7x megacore.
            dimension_semantics=("parallel",),
            vmem_limit_bytes=vmem_limit,
        ),
        cost_estimate=cost,
        input_output_aliases=io_aliases,
    )(arg56_1, addend)


if __name__ == "__main__":
    key = jax.random.PRNGKey(0)
    k1, k2 = jax.random.split(key)

    # arg56_1 has more than 256 rows so the split actually discards a tail;
    # addend matches the first chunk's shape.
    D = 128
    arg56_1 = jax.random.normal(k1, (512, D), dtype=jnp.float32)
    addend = jax.random.normal(k2, (SPLIT, D), dtype=jnp.float32)

    out = pattern_module_forward(arg56_1, addend)
    jax.block_until_ready(out)

    # Correctness check against the pure-JAX reference of the PyTorch semantics.
    ref = arg56_1[:SPLIT] + addend
    assert out.shape == (SPLIT, D)
    assert out.dtype == ref.dtype
    assert jnp.allclose(out, ref, atol=1e-6), "mismatch vs reference"

    print("KERNEL_OK")
</pallas_src>

<mosaic_0001>
module attributes {stable_mosaic.version = 11 : i64} {
  func.func @_split_add_kernel(%arg0: i32, %arg1: memref<128x128xf32, #tpu.memory_space<vmem>>, %arg2: memref<128x128xf32, #tpu.memory_space<vmem>>, %arg3: memref<128x128xf32, #tpu.memory_space<vmem>>) attributes {dimension_semantics = [#tpu.dimension_semantics<parallel>], iteration_bounds = array<i64: 2>, scalar_prefetch = 0 : i64, scratch_operands = 0 : i64, tpu.core_type = #tpu.core_type<tc>, window_params = [{transform_indices = @transform_0, window_bounds = array<i64: 128, 128>}, {transform_indices = @transform_1, window_bounds = array<i64: 128, 128>}, {transform_indices = @transform_2, window_bounds = array<i64: 128, 128>}]} {
    %c0 = arith.constant 0 : index
    %c0_0 = arith.constant 0 : index
    %0 = vector.load %arg1[%c0, %c0_0] : memref<128x128xf32, #tpu.memory_space<vmem>>, vector<128x128xf32>
    %c0_1 = arith.constant 0 : index
    %c0_2 = arith.constant 0 : index
    %1 = vector.load %arg2[%c0_1, %c0_2] : memref<128x128xf32, #tpu.memory_space<vmem>>, vector<128x128xf32>
    %2 = arith.addf %0, %1 : vector<128x128xf32>
    %c0_3 = arith.constant 0 : index
    %c0_4 = arith.constant 0 : index
    %3 = vector.load %arg3[%c0_3, %c0_4] : memref<128x128xf32, #tpu.memory_space<vmem>>, vector<128x128xf32>
    tpu.vector_store %arg3[%c0_3, %c0_4], %2 {strides = array<i32>} : memref<128x128xf32, #tpu.memory_space<vmem>>, vector<128x128xf32>,
    return
  }
  func.func @transform_0(%arg0: i32) -> (i32, i32) {
    %c0_i32 = arith.constant 0 : i32
    %c0_i32_0 = arith.constant 0 : i32
    return %arg0, %c0_i32 : i32, i32
  }
  func.func @transform_1(%arg0: i32) -> (i32, i32) {
    %c0_i32 = arith.constant 0 : i32
    %c0_i32_0 = arith.constant 0 : i32
    return %arg0, %c0_i32 : i32, i32
  }
  func.func @transform_2(%arg0: i32) -> (i32, i32) {
    %c0_i32 = arith.constant 0 : i32
    %c0_i32_0 = arith.constant 0 : i32
    return %arg0, %c0_i32 : i32, i32
  }
}

</mosaic_0001>

<bundles_post_ra>
// kernel: tpu_custom_call.1
= control target key start
LH: loop header
LB: loop body
LE: loop exit
PB: predicated region body
PF: predicated region fallthrough
CT: control target
= control target key end

     0   :  { %7 = vsyncpa [#allocation3], 0  ;;  %s887_s0 = inlined_call_operand.hbm [shape: f32[512,128], index: 0, kind: input, shape index: {}]   ;;  %s888_s1 = inlined_call_operand.hbm [shape: f32[256,128], index: 1, kind: input, shape index: {}]   ;;  %s889_s2 = inlined_call_operand.hbm [shape: f32[256,128], index: 2, kind: output, shape index: {}]  }
   0x1   :  { %9 = vsyncpa [#allocation3 + $0x1], 0 }
   0x2   :  { %10 = vsyncpa [#allocation6], 0 }
   0x3   :  { %12 = vsyncpa [#allocation6 + $0x1], 0 }
   0x4   :  { %13 = vsyncpa [#allocation4], 0 }
   0x5   :  { %15 = vsyncpa [#allocation4 + $0x1], 0  ;;  %s609_s9 = smov 0   ;;  %s611_s10 = smov 0  }
   0x6   :  { %s613_s11 = smov 0   ;;  %s615_s12 = smov 0  }
   0x7 LB: > { %s630_s13 = sadd.s32 4294967295, %s585_s12   ;;  %s379_s14 = sadd.s32 4294967294, %s585_s12   ;;  %s585_s12 = sphi %s615_s12, %s905_s12   ;;  %s581_s11 = sphi %s613_s11, %s904_s11   ;;  %s577_s10 = sphi %s611_s10, %s903_s10   ;;  %s573_s9 = sphi %s609_s9, %s902_s9  }
   0x8   : > { %s634_s15 = sadd.s32 1, %s585_s12   ;;  %s28_s16 = sadd.s32 1, %s581_s11 }
   0x9   : > { %s25_s17 = ssub.s32 %s585_s12, %s634_s15  ;;  %p35_p0 = scmp.ne.s32.totalorder %s581_s11, %s577_s10 }
   0xa   : > { %p26_p1 = scmp.eq.s32.totalorder %s25_s17, 0  ;;  %p36_p2 = scmp.eq.s32.totalorder %s585_s12, 0 }
   0xb   : > { %p41_p3 = scmp.ne.s32.totalorder %s577_s10, %s573_s9  ;;  %p42_p4 = scmp.eq.s32.totalorder %s630_s13, 0 }
   0xc   : > { %s646_s18 = scalar_select %p26_p1, %s581_s11, %s28_s16  }
   0xd   : > { %p648_p5 = por %p36_p2, %p35_p0  ;;  %p652_p6 = por %p42_p4, %p41_p3 }
   0xe   : > { %p91_p7 = scmp.eq.s32.totalorder %s630_s13, 1  ;;  %p97_p8 = scmp.eq.s32.totalorder %s379_s14, 1 }
   0xf   : > { %s893_s20 = scalar_select %p652_p6, 1, 0 }
  0x10   : > { %p417_p10 = scmp.lt.s32.totalorder %s585_s12, 2  ;;  %p659_p11 = por %p91_p7, %p35_p0 }
  0x11   : > { %p663_p12 = por %p97_p8, %p41_p3  ;;  %s668_s23 = sand.u32 1, %s581_s11  }
  0x12   : > { %s894_s21 = scalar_select %p659_p11, 1, 0 }
  0x13   : > { %s895_s22 = scalar_select %p663_p12, 1, 0 }
  0x14   : > { %s397_s24 = sshll.u32 %s585_s12, 11  ;;  %s382_s25 = sshll.u32 %s668_s23, 7 }
  0x15   : > { %s677_s28 = scalar_lea.hbm %s887_s0, %s397_s24  ;;  %s121_s29 = scalar_lea.vmem [#allocation2], %s382_s25 }
  0x16   : > { %s128_s30 = sshll.u32 %s121_s29, 4  ;;  %p683_p13 = pnand %p417_p10, %p648_p5  ;;  %s687_s30 = int_to_ptr.vmem [resolvable:$true] %s128_s30 }
  0x17   : > { %s118_s4 = scalar_lea.sflag [#allocation3], %s668_s23  ;;  %s455_s5 = scalar_lea.hbm %s677_s28, 2048 }
  0x18   : > { %p456_p0 = scmp.ne.s32.totalorder %s677_s28, %s455_s5  ;;  %p457_p1 = pneg %p683_p13 }
  0x19   : > { %s460_s8 = scalar_lea.hbm %s887_s0, 8192  ;;  %p461_p4 = scmp.lt.u32.totalorder %s677_s28, %s887_s0 }
  0x1a   : > { %p458_p2 = pnand %p457_p1, %p456_p0  ;;  %p462_p5 = scmp.lt.u32.totalorder %s460_s8, %s455_s5 }
  0x1b   : > { %p464_p8 = scmp.lt.u32.totalorder %s455_s5, %s677_s28 }
  0x1c   : > { %p459_p3 = pneg %p458_p2  ;;  %p463_p7 = por %p462_p5, %p461_p4 }
  0x1e   : > { %p465_p10 = por %p464_p8, %p463_p7 }
  0x20   : > { %p466_p9 = pnand %p465_p10, %p459_p3 }
  0x22   : > { %469 = shalt.err (!%p466_p9)
}
  0x23   : > { %s470_s17 = scalar_lea.vmem %s687_s30, 2048  ;;  %s587_s19 = smov [#allocation2]  }
  0x24   : > { %p471_p0 = scmp.ne.s32.totalorder %s687_s30, %s470_s17  ;;  %s475_s26 = sshll.u32 %s587_s19, 4  ;;  %s476_s26 = int_to_ptr.vmem [resolvable:$false] %s475_s26 }
  0x25   : > { %s477_s27 = scalar_lea.vmem %s476_s26, 4096  ;;  %p478_p11 = scmp.lt.s32.totalorder %s687_s30, %s476_s26 }
  0x26   : > { %p473_p2 = pnand %p471_p0, %p457_p1  ;;  %p479_p4 = scmp.lt.s32.totalorder %s477_s27, %s470_s17 }
  0x28   : > { %p474_p12 = pneg %p473_p2  ;;  %p480_p5 = por %p479_p4, %p478_p11 }
  0x2a   : > { %p481_p7 = pnand %p480_p5, %p474_p12 }
  0x2c   : > { %484 = shalt.err (!%p481_p7)
}
  0x2d   : > { %s588_s29 = smov 128   ;;  %s589_s5 = smov 8  }
  0x2e   : > { %409 = dma.hbm_to_vmem [thread:$0]  (!%p683_p13), %s677_s28, 2048, %s687_s30, %s118_s4, %s588_s29, %s588_s29, %s589_s5  }
  0x2f   : > { %p388_p9 = scmp.ge.s32.totalorder %s585_s12, 1  ;;  %p157_p11 = scmp.lt.s32.totalorder %s585_s12, 3 }
  0x30   : > { %s731_s14 = scalar_lea.hbm %s888_s1, %s397_s24  ;;  %s142_s16 = scalar_lea.vmem [#allocation5], %s382_s25 }
  0x31   : > { %p722_p12 = pnand %p388_p9, %p157_p11  ;;  %s149_s17 = sshll.u32 %s142_s16, 4  ;;  %s735_s17 = int_to_ptr.vmem [resolvable:$true] %s149_s17 }
  0x32   : > { %s139_s28 = scalar_lea.sflag [#allocation6], %s668_s23  ;;  %s485_s30 = scalar_lea.hbm %s731_s14, 2048 }
  0x33   : > { %p486_p3 = scmp.ne.s32.totalorder %s731_s14, %s485_s30  ;;  %s490_s24 = scalar_lea.hbm %s888_s1, 4096 }
  0x34   : > { %p491_p0 = scmp.lt.u32.totalorder %s731_s14, %s888_s1  ;;  %p492_p2 = scmp.lt.u32.totalorder %s490_s24, %s485_s30 }
  0x35   : > { %p488_p8 = pnand %p486_p3, %p457_p1  ;;  %p494_p5 = scmp.lt.u32.totalorder %s485_s30, %s731_s14 }
  0x36   : > { %p493_p4 = por %p492_p2, %p491_p0 }
  0x37   : > { %p489_p10 = pneg %p488_p8 }
  0x38   : > { %p495_p7 = por %p494_p5, %p493_p4 }
  0x3a   : > { %p496_p9 = pnand %p495_p7, %p489_p10 }
  0x3c   : > { %499 = shalt.err (!%p496_p9)
}
  0x3d   : > { %s500_s25 = scalar_lea.vmem %s735_s17, 2048  ;;  %s590_s7 = smov [#allocation5]  }
  0x3e   : > { %p501_p11 = scmp.ne.s32.totalorder %s735_s17, %s500_s25  ;;  %s505_s8 = sshll.u32 %s590_s7, 4  ;;  %s506_s8 = int_to_ptr.vmem [resolvable:$false] %s505_s8 }
  0x3f   : > { %s507_s16 = scalar_lea.vmem %s506_s8, 4096  ;;  %p508_p6 = scmp.lt.s32.totalorder %s735_s17, %s506_s8 }
  0x40   : > { %p503_p3 = pnand %p501_p11, %p457_p1  ;;  %p509_p0 = scmp.lt.s32.totalorder %s507_s16, %s500_s25 }
  0x42   : > { %p504_p8 = pneg %p503_p3  ;;  %p510_p2 = por %p509_p0, %p508_p6 }
  0x44   : > { %p511_p4 = pnand %p510_p2, %p504_p8 }
  0x46   : > { %514 = shalt.err (!%p511_p4)
}
  0x47   : > { %412 = dma.hbm_to_vmem [thread:$0]  (!%p683_p13), %s731_s14, 2048, %s735_s17, %s139_s28, %s588_s29, %s588_s29, %s589_s5  }
  0x48   : > { %161 = sbr.rel (%p722_p12) target bundleno = 112 (0x70), region = 28  ;;  %s769_s30 = sand.u32 (!%p722_p12), 1, %s577_s10  }
  0x49   : > { %s389_s4 = sshll.u32 (!%p722_p12), %s769_s30, 7  ;;  %s164_s19 = scalar_lea.sflag (!%p722_p12), [#allocation3], %s769_s30 }
  0x4a   : > { %s773_s3 = scalar_lea.vmem (!%p722_p12), [#allocation2], %s389_s4  ;;  %p898_p6 = scmp.ne.s32.totalorder (!%p722_p12), %s893_s20, 0 }
  0x4f   : > { %560 = dma.done.wait (%p898_p6), %s164_s19, 2048  }
  0x50   : > { %562 = vsyncadd (%p898_p6), %s164_s19, 4294965248  ;;  %s173_s23 = scalar_lea.sflag [#allocation6], %s769_s30  ;;  %s780_s29 = scalar_lea.vmem [#allocation5], %s389_s4 }
  0x51   : > { %564 = dma.done.wait (%p898_p6), %s173_s23, 2048  }
  0x52   : > { %566 = vsyncadd (%p898_p6), %s173_s23, 4294965248  ;;  %v205_v0 = vld [vmem:[%s773_s3] sm:$0xff]  ;;  %v206_v2 = vld [vmem:[%s773_s3 + $0x8] sm:$0xff]  ;;  %s795_s20 = scalar_lea.vmem [#allocation7], %s389_s4  ;;  %s399_s5 = sshll.u32 %s630_s13, 11 }
  0x53   : > { %v221_v1 = vld [vmem:[%s780_s29] sm:$0xff]  ;;  %v222_v4 = vld [vmem:[%s780_s29 + $0x8] sm:$0xff]  ;;  %v207_v5 = vld [vmem:[%s773_s3 + $0x10] sm:$0xff]  ;;  %s283_s6 = sshll.u32 %s795_s20, 4  ;;  %s837_s17 = scalar_lea.hbm %s889_s2, %s399_s5  ;;  %s839_s6 = int_to_ptr.vmem [resolvable:$true] %s283_s6 }
  0x54   : > { %v237_v3 = vadd.f32 %v221_v1, %v205_v0  ;;  %v223_v6 = vld [vmem:[%s780_s29 + $0x10] sm:$0xff]  ;;  %v238_v7 = vadd.f32 %v222_v4, %v206_v2  ;;  %v208_v9 = vld [vmem:[%s773_s3 + $0x18] sm:$0xff]  ;;  %v209_v11 = vld [vmem:[%s773_s3 + $0x20] sm:$0xff]  ;;  %s270_s28 = scalar_lea.sflag [#allocation4], %s769_s30  ;;  %s515_s24 = scalar_lea.vmem %s839_s6, 2048 }
  0x55   : > { %v239_v8 = vadd.f32 %v223_v6, %v207_v5  ;;  %v224_v10 = vld [vmem:[%s780_s29 + $0x18] sm:$0xff]  ;;  %v225_v13 = vld [vmem:[%s780_s29 + $0x20] sm:$0xff]  ;;  %v210_v14 = vld [vmem:[%s773_s3 + $0x28] sm:$0xff]  ;;  %p516_p13 = scmp.ne.s32.totalorder %s839_s6, %s515_s24  ;;  %p899_p1 = scmp.ne.s32.totalorder %s894_s21, 0 }
  0x56   : > { %253 = vst [vmem:[%s795_s20] sm:$0xff] %v237_v3  ;;  %v240_v12 = vadd.f32 %v224_v10, %v208_v9  ;;  %v226_v15 = vld [vmem:[%s780_s29 + $0x28] sm:$0xff]  ;;  %254 = vst [vmem:[%s795_s20 + $0x8] sm:$0xff] %v238_v7  ;;  %v241_v16 = vadd.f32 %v225_v13, %v209_v11  ;;  %v211_v18 = vld [vmem:[%s773_s3 + $0x30] sm:$0xff]  ;;  %s591_s26 = smov [#allocation7]  }
  0x57   : > { %255 = vst [vmem:[%s795_s20 + $0x10] sm:$0xff] %v239_v8  ;;  %v242_v17 = vadd.f32 %v226_v15, %v210_v14  ;;  %v227_v19 = vld [vmem:[%s780_s29 + $0x30] sm:$0xff]  ;;  %v212_v20 = vld [vmem:[%s773_s3 + $0x38] sm:$0xff]  ;;  %v213_v23 = vld [vmem:[%s773_s3 + $0x40] sm:$0xff]  ;;  %p517_p12 = pnand %p516_p13, %p899_p1  ;;  %s519_s27 = sshll.u32 %s591_s26, 4  ;;  %s520_s27 = int_to_ptr.vmem [resolvable:$false] %s519_s27 }
  0x58   : > { %256 = vst [vmem:[%s795_s20 + $0x18] sm:$0xff] %v240_v12  ;;  %v243_v21 = vadd.f32 %v227_v19, %v211_v18  ;;  %v228_v22 = vld [vmem:[%s780_s29 + $0x38] sm:$0xff]  ;;  %v229_v24 = vld [vmem:[%s780_s29 + $0x40] sm:$0xff]  ;;  %257 = vst [vmem:[%s795_s20 + $0x20] sm:$0xff] %v241_v16  ;;  %s521_s25 = scalar_lea.vmem %s520_s27, 4096  ;;  %p522_p5 = scmp.lt.s32.totalorder %s839_s6, %s520_s27 }
  0x59   : > { %258 = vst [vmem:[%s795_s20 + $0x28] sm:$0xff] %v242_v17  ;;  %v244_v25 = vadd.f32 %v228_v22, %v212_v20  ;;  %v245_v26 = vadd.f32 %v229_v24, %v213_v23  ;;  %v214_v27 = vld [vmem:[%s773_s3 + $0x48] sm:$0xff]  ;;  %v215_v29 = vld [vmem:[%s773_s3 + $0x50] sm:$0xff]  ;;  %v216_v32 = vld [vmem:[%s773_s3 + $0x58] sm:$0xff]  ;;  %p518_p10 = pneg %p517_p12  ;;  %p523_p7 = scmp.lt.s32.totalorder %s521_s25, %s515_s24 }
  0x5a   : > { %v230_v28 = vld [vmem:[%s780_s29 + $0x48] sm:$0xff]  ;;  %259 = vst [vmem:[%s795_s20 + $0x30] sm:$0xff] %v243_v21  ;;  %v231_v31 = vld [vmem:[%s780_s29 + $0x50] sm:$0xff]  ;;  %v232_v33 = vld [vmem:[%s780_s29 + $0x58] sm:$0xff] }
  0x5b   : > { %v246_v30 = vadd.f32 %v230_v28, %v214_v27  ;;  %260 = vst [vmem:[%s795_s20 + $0x38] sm:$0xff] %v244_v25  ;;  %261 = vst [vmem:[%s795_s20 + $0x40] sm:$0xff] %v245_v26  ;;  %v247_v34 = vadd.f32 %v231_v31, %v215_v29  ;;  %v248_v35 = vadd.f32 %v232_v33, %v216_v32  ;;  %v217_v36 = vld [vmem:[%s773_s3 + $0x60] sm:$0xff]  ;;  %v218_v38 = vld [vmem:[%s773_s3 + $0x68] sm:$0xff]  ;;  %p524_p9 = por %p523_p7, %p522_p5 }
  0x5c   : > { %v233_v37 = vld [vmem:[%s780_s29 + $0x60] sm:$0xff]  ;;  %v234_v40 = vld [vmem:[%s780_s29 + $0x68] sm:$0xff]  ;;  %v219_v41 = vld [vmem:[%s773_s3 + $0x70] sm:$0xff] }
  0x5d   : > { %262 = vst [vmem:[%s795_s20 + $0x48] sm:$0xff] %v246_v30  ;;  %v249_v39 = vadd.f32 %v233_v37, %v217_v36  ;;  %v235_v42 = vld [vmem:[%s780_s29 + $0x70] sm:$0xff]  ;;  %263 = vst [vmem:[%s795_s20 + $0x50] sm:$0xff] %v247_v34  ;;  %v250_v43 = vadd.f32 %v234_v40, %v218_v38  ;;  %v220_v45 = vld [vmem:[%s773_s3 + $0x78] sm:$0xff]  ;;  %p525_p11 = pnand %p524_p9, %p518_p10 }
  0x5e   : > { %264 = vst [vmem:[%s795_s20 + $0x58] sm:$0xff] %v248_v35  ;;  %v251_v44 = vadd.f32 %v235_v42, %v219_v41  ;;  %v236_v46 = vld [vmem:[%s780_s29 + $0x78] sm:$0xff] }
  0x5f   : > { %265 = vst [vmem:[%s795_s20 + $0x60] sm:$0xff] %v249_v39  ;;  %v252_v47 = vadd.f32 %v236_v46, %v220_v45  ;;  %266 = vst [vmem:[%s795_s20 + $0x68] sm:$0xff] %v250_v43 }
  0x60   : > { %267 = vst [vmem:[%s795_s20 + $0x70] sm:$0xff] %v251_v44 }
  0x61   : > { %268 = vst [vmem:[%s795_s20 + $0x78] sm:$0xff] %v252_v47 }
  0x62   : > { %528 = shalt.err (!%p525_p11)
}
  0x63   : > { %s529_s7 = scalar_lea.hbm %s837_s17, 2048  ;;  %s533_s4 = scalar_lea.hbm %s889_s2, 4096 }
  0x64   : > { %p530_p3 = scmp.ne.s32.totalorder %s837_s17, %s529_s7  ;;  %p534_p2 = scmp.lt.u32.totalorder %s837_s17, %s889_s2 }
  0x65   : > { %p535_p4 = scmp.lt.u32.totalorder %s533_s4, %s529_s7  ;;  %p537_p13 = scmp.lt.u32.totalorder %s529_s7, %s837_s17 }
  0x66   : > { %p531_p8 = pnand %p530_p3, %p899_p1 }
  0x67   : > { %p536_p6 = por %p535_p4, %p534_p2 }
  0x68   : > { %p532_p0 = pneg %p531_p8 }
  0x69   : > { %p538_p12 = por %p537_p13, %p536_p6 }
  0x6b   : > { %p539_p10 = pnand %p538_p12, %p532_p0 }
  0x6d   : > { %542 = shalt.err (!%p539_p10)
}
  0x6e   : > { %s592_s23 = smov 128   ;;  %s593_s29 = smov 8  }
  0x6f   : > { %404 = dma.vmem_to_hbm [thread:$0]  (%p899_p1), %s839_s6, 2048, %s837_s17, %s270_s28, %s592_s23, %s592_s23, %s593_s29  }
  0x70 PF: > { %s298_s20 = sand.u32 1, %s573_s9   ;;  %p900_p5 = scmp.ne.s32.totalorder %s895_s22, 0 }
  0x71   : > { %p901_p7 = scmp.ge.s32.totalorder %s585_s12, 2  ;;  %s299_s5 = scalar_lea.sflag [#allocation4], %s298_s20 }
  0x73   : > { %p414_p9 = pnand %p901_p7, %p900_p5 }
  0x75   : > { %568 = dma.done.wait (!%p414_p9), %s299_s5, 2048  }
  0x76   : > { %570 = vsyncadd (!%p414_p9), %s299_s5, 4294965248  ;;  %p18_p11 = scmp.ge.s32.totalorder %s634_s15, 4   ;;  %s902_s9 = smov %s577_s10 }
  0x77   : > { %s903_s10 = smov %s581_s11  ;;  %s904_s11 = smov %s646_s18 }
  0x78   : > { %s905_s12 = smov %s634_s15  ;;  %20 = sbr.rel (!%p18_p11) target bundleno = 7 (0x7), region = 86 }
  0x7f   :  { %304 = vsyncpa [#allocation3], 1 }
  0x80   :  { %306 = vsyncpa [#allocation3 + $0x1], 1 }
  0x81   :  { %307 = vsyncpa [#allocation6], 1 }
  0x82   :  { %309 = vsyncpa [#allocation6 + $0x1], 1 }
  0x83   :  { %310 = vsyncpa [#allocation4], 1 }
  0x84   :  { %312 = vsyncpa [#allocation4 + $0x1], 1 }

</bundles_post_ra>
